<compile_context>
chip_gen: v6e
topology: v6e:2x2x1
jax: 0.10.0
libtpu: 0.0.40
codegen_flags: <defaults>
</compile_context>

<pallas_src>
import functools

import jax
import jax.numpy as jnp
from jax.experimental import pallas as pl
from jax.experimental.pallas import tpu as pltpu


def _round_up(a, b):
    return (a + b - 1) // b * b


def _pick_tile(dim, candidates, align):
    """Pick the tile (from descending `candidates`) minimizing padding of `dim`;
    ties go to the larger tile.  Small dims just round up to `align`."""
    if dim <= candidates[-1]:
        return _round_up(dim, align)
    best_pad, best_tile = None, None
    for c in candidates:
        pad = _round_up(dim, c)
        if best_pad is None or pad < best_pad:
            best_pad, best_tile = pad, c
    return best_tile


def _maybe_pad(a, shape):
    if tuple(a.shape) == tuple(shape):
        return a
    return jnp.pad(a, [(0, t - s) for s, t in zip(a.shape, shape)])


# --------------------------------------------------------------------------
# Small-shape fused kernel: whole problem in one VMEM tile, one launch.
# --------------------------------------------------------------------------
def _fused_small_kernel(x_ref, w_ref, b_ref, o_ref):
    y = jnp.dot(x_ref[...], w_ref[...], preferred_element_type=jnp.float32)
    y = y + b_ref[...]
    scale = jnp.clip(jnp.min(y), 0.0, 6.0) / 6.0
    o_ref[...] = (y * scale).astype(o_ref.dtype)


# --------------------------------------------------------------------------
# Tiled pass 1: y = x @ W + b  (accumulated directly in the f32 output block)
# plus a lane-dense (8, 128) per-(i, j)-tile partial min over valid elements.
# --------------------------------------------------------------------------
def _matmul_min_kernel(x_ref, w_ref, b_ref, y_ref, mins_ref, *,
                       m_valid, n_valid, mask_rows, mask_cols):
    i = pl.program_id(0)
    j = pl.program_id(1)
    k = pl.program_id(2)

    @pl.when(k == 0)
    def _():
        y_ref[...] = jnp.zeros_like(y_ref)

    y_ref[...] += jnp.dot(x_ref[...], w_ref[...],
                          preferred_element_type=jnp.float32)

    @pl.when(k == pl.num_programs(2) - 1)
    def _():
        tm, tn = y_ref.shape
        # Bias added exactly once, at the finalize step.
        y = y_ref[...] + b_ref[...]
        y_ref[...] = y

        def _write_min(v):
            mins_ref[...] = jnp.full(mins_ref.shape, v, dtype=jnp.float32)

        if not mask_rows and not mask_cols:
            # No padding anywhere -> cheap unmasked reduce for every tile.
            _write_min(jnp.min(y))
        else:
            conds = []
            if mask_rows:
                conds.append(i == pl.num_programs(0) - 1)
            if mask_cols:
                conds.append(j == pl.num_programs(1) - 1)
            edge = functools.reduce(jnp.logical_or, conds)

            @pl.when(edge)
            def _():
                rmask = (jax.lax.broadcasted_iota(jnp.int32, (tm, 1), 0)
                         + i * tm) < m_valid
                cmask = (jax.lax.broadcasted_iota(jnp.int32, (1, tn), 1)
                         + j * tn) < n_valid
                valid = jnp.logical_and(rmask, cmask)
                _write_min(jnp.min(jnp.where(valid, y, jnp.inf)))

            @pl.when(jnp.logical_not(edge))
            def _():
                _write_min(jnp.min(y))


# --------------------------------------------------------------------------
# Wrapper
# --------------------------------------------------------------------------
_SMALL_M, _SMALL_N, _SMALL_K = 512, 1024, 1024


def _linear_clampmin_2d(x, w, b, *, compute_dtype=None):
    """x: [M, K], w: [K, N], b: [N]  ->  [M, N] float32."""
    M, K = x.shape
    Kw, N = w.shape
    assert K == Kw and b.shape == (N,)
    b2 = b.astype(jnp.float32).reshape(1, N)

    # ---- small-shape fallback: one fused single-tile kernel --------------
    if M <= _SMALL_M and N <= _SMALL_N and K <= _SMALL_K:
        return pl.pallas_call(
            _fused_small_kernel,
            out_shape=jax.ShapeDtypeStruct((M, N), jnp.float32),
            grid=(1,),
            in_specs=[pl.BlockSpec((M, K), lambda i: (0, 0)),
                      pl.BlockSpec((K, N), lambda i: (0, 0)),
                      pl.BlockSpec((1, N), lambda i: (0, 0))],
            out_specs=pl.BlockSpec((M, N), lambda i: (0, 0)),
        )(x, w, b2)

    # ---- tiled path -------------------------------------------------------
    tm = _pick_tile(M, (512, 256, 128), 8)
    tn = _pick_tile(N, (1024, 512, 256, 128), 128)
    tk = _pick_tile(K, (512, 256, 128), 128)
    M_pad, N_pad, K_pad = _round_up(M, tm), _round_up(N, tn), _round_up(K, tk)
    Mt, Nt, Kt = M_pad // tm, N_pad // tn, K_pad // tk

    op_dtype = x.dtype if compute_dtype is None else compute_dtype
    # TODO(synk): for inference-style reuse, pre-pad/cast w_p and b_p once at
    # load time instead of on every call (here only skipped when already aligned).
    x_p = _maybe_pad(x, (M_pad, K_pad)).astype(op_dtype)
    w_p = _maybe_pad(w, (K_pad, N_pad)).astype(op_dtype)
    b_p = _maybe_pad(b2, (1, N_pad))

    kernel = functools.partial(
        _matmul_min_kernel,
        m_valid=M, n_valid=N,
        mask_rows=(M_pad != M), mask_cols=(N_pad != N))

    y_pad, part_mins = pl.pallas_call(
        kernel,
        out_shape=(jax.ShapeDtypeStruct((M_pad, N_pad), jnp.float32),
                   jax.ShapeDtypeStruct((Mt * 8, Nt * 128), jnp.float32)),
        grid_spec=pltpu.PrefetchScalarGridSpec(
            num_scalar_prefetch=0,
            grid=(Mt, Nt, Kt),
            in_specs=[
                pl.BlockSpec((tm, tk), lambda i, j, k: (i, k)),
                pl.BlockSpec((tk, tn), lambda i, j, k: (k, j)),
                pl.BlockSpec((1, tn), lambda i, j, k: (0, j)),
            ],
            out_specs=[
                pl.BlockSpec((tm, tn), lambda i, j, k: (i, j)),
                pl.BlockSpec((8, 128), lambda i, j, k: (i, j)),
            ],
        ),
        compiler_params=pltpu.CompilerParams(
            dimension_semantics=("parallel", "parallel", "arbitrary")),
    )(x_p, w_p, b_p)

    # Scalar glue + fused slice*mul in XLA: touches only the valid (M, N)
    # region once (no padded-array round trip, no extra slice copy).
    scale = jnp.clip(jnp.min(part_mins), 0.0, 6.0) / 6.0
    return y_pad[:M, :N] * scale


def linear_clampmin(x, w, b, *, compute_dtype=None):
    """General entry point: flattens leading dims like nn.Linear."""
    lead = x.shape[:-1]
    out = _linear_clampmin_2d(x.reshape((-1, x.shape[-1])), w, b,
                              compute_dtype=compute_dtype)
    return out.reshape(lead + (w.shape[1],))


def reference(x, w, b):
    y = jnp.dot(x, w, precision=jax.lax.Precision.HIGHEST) + b
    return y * jnp.clip(jnp.min(y), 0.0, 6.0) / 6.0


if __name__ == "__main__":
    key = jax.random.PRNGKey(0)

    def make_inputs(k, m, kk, n):
        kx, kw, kb = jax.random.split(k, 3)
        x = jax.random.uniform(kx, (m, kk), dtype=jnp.float32)
        w = jax.random.uniform(kw, (kk, n), minval=-0.05, maxval=0.05,
                               dtype=jnp.float32)
        b = jax.random.uniform(kb, (n,), minval=2.0, maxval=2.5,
                               dtype=jnp.float32)
        return x, w, b

    k1, k2 = jax.random.split(key)

    # 1) Small shapes consistent with the module (fused single-tile path).
    x, w, b = make_inputs(k1, 8, 32, 16)
    out = jax.block_until_ready(jax.jit(linear_clampmin)(x, w, b))
    ref = reference(x, w, b)
    assert out.shape == (8, 16)
    assert jnp.allclose(out, ref, atol=1e-4, rtol=1e-4)

    # 2) Tiled two-pass path with N-padding / edge masking (f32 operands).
    x2, w2, b2 = make_inputs(k2, 640, 384, 272)
    out2 = jax.block_until_ready(jax.jit(linear_clampmin)(x2, w2, b2))
    ref2 = reference(x2, w2, b2)
    assert out2.shape == (640, 272)
    assert jnp.allclose(out2, ref2, atol=2e-3, rtol=2e-3)

    # 3) bf16-operand path (f32 accumulation) — the v6e/v7x throughput mode.
    fn_bf16 = jax.jit(functools.partial(linear_clampmin,
                                        compute_dtype=jnp.bfloat16))
    out3 = jax.block_until_ready(fn_bf16(x2, w2, b2))
    assert jnp.allclose(out3, ref2, atol=5e-2, rtol=5e-2)

    print("KERNEL_OK")
</pallas_src>

<mosaic_0001>
module attributes {stable_mosaic.version = 11 : i64} {
  func.func @_fused_small_kernel(%arg0: i32, %arg1: memref<8x32xf32, #tpu.memory_space<vmem>>, %arg2: memref<32x16xf32, #tpu.memory_space<vmem>>, %arg3: memref<1x16xf32, #tpu.memory_space<vmem>>, %arg4: memref<8x16xf32, #tpu.memory_space<vmem>>) attributes {dimension_semantics = [#tpu.dimension_semantics<arbitrary>], iteration_bounds = array<i64: 1>, scalar_prefetch = 0 : i64, scratch_operands = 0 : i64, tpu.core_type = #tpu.core_type<tc>, window_params = [{pipeline_mode = #tpu.pipeline_mode<synchronous>, transform_indices = @transform_0, window_bounds = array<i64: 8, 32>}, {pipeline_mode = #tpu.pipeline_mode<synchronous>, transform_indices = @transform_1, window_bounds = array<i64: 32, 16>}, {pipeline_mode = #tpu.pipeline_mode<synchronous>, transform_indices = @transform_2, window_bounds = array<i64: 1, 16>}, {pipeline_mode = #tpu.pipeline_mode<synchronous>, transform_indices = @transform_3, window_bounds = array<i64: 8, 16>}]} {
    %c0 = arith.constant 0 : index
    %c0_0 = arith.constant 0 : index
    %0 = vector.load %arg1[%c0, %c0_0] : memref<8x32xf32, #tpu.memory_space<vmem>>, vector<8x32xf32>
    %c0_1 = arith.constant 0 : index
    %c0_2 = arith.constant 0 : index
    %1 = vector.load %arg2[%c0_1, %c0_2] : memref<32x16xf32, #tpu.memory_space<vmem>>, vector<32x16xf32>
    %cst = arith.constant dense<0.000000e+00> : vector<8x16xf32>
    %2 = tpu.matmul %0, %1, %cst {dimension_numbers = #tpu.dot_dimension_numbers<[1], [0], [0], [1], [0, 0, 1, 1], [], []>} : vector<8x32xf32>, vector<32x16xf32>, vector<8x16xf32> -> vector<8x16xf32>
    %c0_3 = arith.constant 0 : index
    %c0_4 = arith.constant 0 : index
    %3 = vector.load %arg3[%c0_3, %c0_4] : memref<1x16xf32, #tpu.memory_space<vmem>>, vector<1x16xf32>
    %4 = vector.broadcast %3 : vector<1x16xf32> to vector<8x16xf32>
    %5 = arith.addf %2, %4 : vector<8x16xf32>
    %6 = vector.shape_cast %5 : vector<8x16xf32> to vector<1x8x16xf32>
    %cst_5 = arith.constant dense<0x7F800000> : vector<1xf32>
    %7 = vector.multi_reduction <minimumf>, %6, %cst_5 [1, 2] : vector<1x8x16xf32> to vector<1xf32>
    %8 = vector.shape_cast %7 : vector<1xf32> to vector<1x1x1xf32>
    %9 = vector.extract %8[0, 0, 0] : f32 from vector<1x1x1xf32>
    %cst_6 = arith.constant 0.000000e+00 : f32
    %cst_7 = arith.constant 6.000000e+00 : f32
    %10 = arith.maximumf %cst_6, %9 : f32
    %11 = arith.minimumf %cst_7, %10 : f32
    %cst_8 = arith.constant 6.000000e+00 : f32
    %12 = arith.divf %11, %cst_8 : f32
    %13 = vector.broadcast %12 : f32 to vector<8x16xf32>
    %14 = arith.mulf %5, %13 : vector<8x16xf32>
    %c0_9 = arith.constant 0 : index
    %c0_10 = arith.constant 0 : index
    %15 = vector.load %arg4[%c0_9, %c0_10] : memref<8x16xf32, #tpu.memory_space<vmem>>, vector<8x16xf32>
    tpu.vector_store %arg4[%c0_9, %c0_10], %14 {strides = array<i32>} : memref<8x16xf32, #tpu.memory_space<vmem>>, vector<8x16xf32>,
    return
  }
  func.func @transform_0(%arg0: i32) -> (i32, i32) {
    %c0_i32 = arith.constant 0 : i32
    %c0_i32_0 = arith.constant 0 : i32
    %c0_i32_1 = arith.constant 0 : i32
    return %c0_i32, %c0_i32_0 : i32, i32
  }
  func.func @transform_1(%arg0: i32) -> (i32, i32) {
    %c0_i32 = arith.constant 0 : i32
    %c0_i32_0 = arith.constant 0 : i32
    %c0_i32_1 = arith.constant 0 : i32
    return %c0_i32, %c0_i32_0 : i32, i32
  }
  func.func @transform_2(%arg0: i32) -> (i32, i32) {
    %c0_i32 = arith.constant 0 : i32
    %c0_i32_0 = arith.constant 0 : i32
    %c0_i32_1 = arith.constant 0 : i32
    return %c0_i32, %c0_i32_0 : i32, i32
  }
  func.func @transform_3(%arg0: i32) -> (i32, i32) {
    %c0_i32 = arith.constant 0 : i32
    %c0_i32_0 = arith.constant 0 : i32
    %c0_i32_1 = arith.constant 0 : i32
    return %c0_i32, %c0_i32_0 : i32, i32
  }
}

</mosaic_0001>

<bundles_post_ra>
// kernel: linear_clampmin.1
= control target key start
LH: loop header
LB: loop body
LE: loop exit
PB: predicated region body
PF: predicated region fallthrough
CT: control target
= control target key end

     0   :  { %v181_v1 = vmov 0.0   ;;  %vm182_vm0 = vmmov 0   ;;  %s229_s0 = inlined_call_operand.vmem [shape: f32[8,32], index: 0, kind: input, shape index: {}]   ;;  %s230_s1 = inlined_call_operand.vmem [shape: f32[32,16], index: 1, kind: input, shape index: {}]   ;;  %s231_s2 = inlined_call_operand.vmem [shape: f32[1,16], index: 2, kind: input, shape index: {}]   ;;  %s232_s3 = inlined_call_operand.hbm [shape: f32[8,16], index: 3, kind: output, shape index: {}]  }
   0x1   :  { %v19_v0 = vld [vmem:[%s230_s1 + $0x18] sm:$0xff]  ;;  %141 = vmatprep.subr.mxu0 %v181_v1  ;;  %v18_v2 = vld [vmem:[%s230_s1 + $0x10] sm:$0xff]  ;;  %149 = vmatprep.mubr.msk.f32.mxu0 %vm182_vm0, %v181_v1 }
   0x2   :  { %142 = vmatpush3.msra.mxu0 %v19_v0 }
   0x3   :  { %8 = vsyncpa [#allocation3], 0  ;;  %143 = vmatprep.subr.mxu0 %v181_v1  ;;  %v17_v3 = vld [vmem:[%s230_s1 + $0x8] sm:$0xff]  ;;  %v16_v4 = vld [vmem:[%s230_s1] sm:$0xff]  ;;  %vm27_vm1 = vcmask 261120   ;;  %vm101_vm2 = vcmask 130048  }
   0x4   :  { %144 = vmatpush3.msra.mxu0 %v18_v2  ;;  %v15_v5 = vld [vmem:[%s229_s0] sm:$0xff]  ;;  %s183_s1 = smov 0.0   ;;  %s184_s25 = smov 6.0  }
   0x5   :  { %145 = vmatprep.subr.mxu0 %v181_v1  ;;  %v134_v6 = vld [vmem:[%s231_s2] ss:$0 sm:$0xff]  ;;  %s185_s27 = smov [#allocation2]  }
   0x6   :  { %146 = vmatpush3.msra.mxu0 %v17_v3  ;;  %s126_s28 = sshll.u32 %s185_s27, 4  ;;  %s127_s28 = int_to_ptr.vmem [resolvable:$true] %s126_s28 }
   0x7   :  { %147 = vmatprep.subr.mxu0 %v181_v1  ;;  %s159_s29 = scalar_lea.vmem %s127_s28, 128  ;;  %p164_p1 = scmp.lt.s32.totalorder %s127_s28, %s127_s28 }
   0x8   :  { %148 = vmatpush3.msra.mxu0 %v16_v4  ;;  %p160_p0 = scmp.ne.s32.totalorder %s127_s28, %s159_s29  ;;  %p165_p2 = scmp.lt.s32.totalorder %s159_s29, %s159_s29 }
   0x9   :  { %150 = vmatmul.mubr.msk.f32.vlgmr.msra.gmra.mxu0 %vm27_vm1, %v15_v5 }
   0xa   :  { %p166_p3 = por %p165_p2, %p164_p1 }
   0xc   :  { %p167_p4 = pnand %p166_p3, %p160_p0 }
  0xc9   :  { %v97_v7 = vpop.f32.mrf.mxu0 }
  0xca   :  { %v98_v8 = vadd.f32 %v134_v6, %v97_v7 }
  0xcb   :  { %v151_v9 = vpop.f32.mrf.mxu0 }
  0xcc   :  { %v102_v10 = vsel %vm101_vm2, %v98_v8, inf }
  0xcd   :  { %103 = vmin.xlane.f32.xlu0 %v102_v10 }
 0x156   :  { %v104_v11 = vpop.xlane.xlu0 %103 }
 0x157   :  { %v105_v12 = vrot.slane %v104_v11, 4 }
 0x159   :  { %v106_v13 = vmin.f32 %v104_v11, %v105_v12 }
 0x15b   :  { %v107_v14 = vrot.slane %v106_v13, 2 }
 0x15d   :  { %v108_v15 = vmin.f32 %v106_v13, %v107_v14 }
 0x15f   :  { %v109_v16 = vrot.slane %v108_v15, 1 }
 0x161   :  { %v110_v17 = vmin.f32 %v108_v15, %v109_v16 }
 0x163   :  { %152 = vpush %v110_v17 }
 0x194   :  { %s153_s0 = spop %152 }
 0x195   :  { %s112_s24 = smax.f32 %s183_s1, %s153_s0 }
 0x196   :  { %s113_s2 = smin.f32 %s184_s25, %s112_s24 }
 0x197   :  { %s116_s26 = smul.f32 0.16666667, %s113_s2 }
 0x199   :  { %v117_v18 = vstv %s116_s26 }
 0x19a   :  { %v118_v19 = vmul.f32 %v117_v18, %v98_v8 }
 0x19c   :  { %119 = vst.msk [vmem:[#allocation2] sm:$0xff] %vm101_vm2, %v118_v19 }
 0x19d   :  { %170 = shalt.err (!%p167_p4)
}
 0x19e   :  { %129 = dma.vmem_to_hbm [thread:$0]  %s127_s28, 128, %s232_s3, [#allocation3]  }
 0x19f   :  { %179 = dma.done.wait [#allocation3], 128  }
 0x1a0   :  { %180 = vsyncadd [#allocation3], 4294967168 }
 0x1a1   :  { %133 = vsyncpa [#allocation3], 1 }

</bundles_post_ra>
